<compile_context>
chip_gen: v7x
topology: tpu7x:2x2x1
jax: 0.10.0
libtpu: 0.0.40
codegen_flags: <defaults>
</compile_context>

<pallas_src>
import functools

import jax
import jax.numpy as jnp
from jax import lax
from jax.experimental import pallas as pl
from jax.experimental.pallas import tpu as pltpu


def _round_up(x, m):
    return (x + m - 1) // m * m


def _cdiv(a, b):
    return -(-a // b)


def _tpu_vmem_capacity_bytes():
    """Best-effort per-core VMEM capacity; conservative default if unknown."""
    try:
        info = pltpu.get_tpu_info()
        for attr in ("vmem_capacity_bytes", "vmem_bytes", "vmem_size_bytes"):
            v = getattr(info, attr, None)
            if v:
                return int(v)
    except Exception:
        pass
    return 64 * 1024 * 1024  # v7x-class (smallest) => safe everywhere


def _lsce_kernel(pred_ref, tgt_ref, out_ref, *, smoothing, n_rows):
    """(tile_n, C) row tile -> one masked per-tile partial loss sum."""
    confidence = 1.0 - smoothing

    x = pred_ref[...]                                   # (tile_n, C), native dtype
    tile_n, c = x.shape

    # Row max in the native dtype (cheap), promoted to f32 for the LSE.
    m = jnp.max(x, axis=-1, keepdims=True).astype(jnp.float32)        # (tile_n, 1)

    # Full log-sum-exp. The (x - m) subtraction and the f32 cast stay fused
    # inside the single exp pass; no block-sized `shifted` temporary survives.
    sumexp = jnp.sum(jnp.exp(x.astype(jnp.float32) - m),
                     axis=-1, keepdims=True)                           # (tile_n, 1)
    lse = m + jnp.log(sumexp)                                          # (tile_n, 1)

    # One weighted reduce folds the target gather and the uniform smoothing
    # mean:  loss_i = lse_i - sum_j w_ij * x_ij,
    #        w_ij   = smoothing/C + confidence * [j == target_i]
    tgt = tgt_ref[...]                                                 # (tile_n, 1) i32
    col = lax.broadcasted_iota(jnp.int32, (tile_n, c), 1)
    w = jnp.where(col == tgt, confidence + smoothing / c, smoothing / c)
    weighted = jnp.sum(w * x.astype(jnp.float32), axis=-1, keepdims=True)

    loss_rows = lse - weighted                                         # (tile_n, 1)

    # Mask rows past N: the ragged last input block reads undefined data, but
    # rows are independent and masked rows never feed the partial sum.
    row = (pl.program_id(0) * tile_n
           + lax.broadcasted_iota(jnp.int32, (tile_n, 1), 0))
    loss_rows = jnp.where(row < n_rows, loss_rows, 0.0)

    tile_sum = jnp.sum(loss_rows)                                      # scalar f32

    # Lane-dense, tile-aligned (8,128) output block: partial sum at [0, 0],
    # exact zeros elsewhere, so the wrapper reduction is a plain jnp.sum.
    r = lax.broadcasted_iota(jnp.int32, (8, 128), 0)
    l = lax.broadcasted_iota(jnp.int32, (8, 128), 1)
    out_ref[...] = jnp.where((r == 0) & (l == 0), tile_sum, 0.0).astype(jnp.float32)


def label_smoothing_cross_entropy(pred, target, smoothing=0.1):
    """pred: (N, C) float, target: (N,) int -> scalar float32 loss."""
    n, c = pred.shape
    itemsize = jnp.dtype(pred.dtype).itemsize

    # Sublane packing for the logits dtype: f32 -> 8, bf16 -> 16, int8/fp8 -> 32.
    sub = 8 * max(1, 4 // itemsize)

    # Generation-aware VMEM budgeting.
    vmem_cap = _tpu_vmem_capacity_bytes()
    if vmem_cap <= 64 * 1024 * 1024:          # v7x-class: 64 MiB per TensorCore
        block_budget = 4 * 1024 * 1024
        vmem_limit = 40 * 1024 * 1024
    else:                                      # v5e / v6e: 128 MiB physical
        block_budget = 6 * 1024 * 1024
        vmem_limit = 64 * 1024 * 1024

    # Row tile: largest multiple of `sub` that keeps one pred block within the
    # budget, capped at ceil(N/2) so megacore chips get >= 2 grid steps.
    rows_budget = (block_budget // max(1, c * itemsize)) // sub * sub
    half_rows = _round_up(_cdiv(n, 2), sub)
    tile_n = max(sub, min(rows_budget, half_rows))
    num_tiles = _cdiv(n, tile_n)

    # For very large C even a minimal tile may exceed the budget: raise the
    # scoped limit to cover pred double-buffering plus the f32 exp temporary.
    # TODO(synk): for huge-vocab C (pred block alone near VMEM capacity), add an
    # inner "arbitrary" C-axis grid with an online log-sum-exp accumulator.
    needed = 2 * tile_n * c * itemsize + 2 * tile_n * c * 4 + (4 << 20)
    if needed > vmem_limit:
        vmem_limit = min(needed, vmem_cap)

    tgt2d = target.astype(jnp.int32).reshape(n, 1)

    partials = pl.pallas_call(
        functools.partial(_lsce_kernel, smoothing=float(smoothing), n_rows=n),
        out_shape=jax.ShapeDtypeStruct((num_tiles * 8, 128), jnp.float32),
        grid=(num_tiles,),
        in_specs=[
            pl.BlockSpec((tile_n, c), lambda i: (i, 0)),
            pl.BlockSpec((tile_n, 1), lambda i: (i, 0)),
        ],
        out_specs=pl.BlockSpec((8, 128), lambda i: (i, 0)),
        compiler_params=pltpu.CompilerParams(
            dimension_semantics=("parallel",),
            vmem_limit_bytes=int(vmem_limit),
        ),
        cost_estimate=pl.CostEstimate(
            flops=int(6 * n * c),
            transcendentals=int(n * c + 2 * n),
            bytes_accessed=int(n * c * itemsize + n * 4 + num_tiles * 8 * 128 * 4),
        ),
    )(pred, tgt2d)

    # All non-partial entries are exact zeros, so this sum is exact.
    return jnp.sum(partials) * (1.0 / n)


def _reference(pred, target, smoothing=0.1):
    confidence = 1.0 - smoothing
    logprobs = jax.nn.log_softmax(pred.astype(jnp.float32), axis=-1)
    nll = -jnp.take_along_axis(logprobs, target[:, None], axis=-1)[:, 0]
    smooth = -jnp.mean(logprobs, axis=-1)
    return jnp.mean(confidence * nll + smoothing * smooth)


if __name__ == "__main__":
    key = jax.random.PRNGKey(0)
    k1, k2, k3, k4 = jax.random.split(key, 4)

    # Small aligned case.
    N, C = 8, 32
    pred = jax.random.normal(k1, (N, C), dtype=jnp.float32)
    target = jax.random.randint(k2, (N,), 0, C, dtype=jnp.int32)
    loss = label_smoothing_cross_entropy(pred, target, smoothing=0.1)
    jax.block_until_ready(loss)
    ref = _reference(pred, target, smoothing=0.1)
    assert jnp.allclose(loss, ref, atol=1e-5, rtol=1e-5), (loss, ref)

    # Ragged case (N not a multiple of the row tile) exercises the mask path.
    N2, C2 = 50, 24
    pred2 = jax.random.normal(k3, (N2, C2), dtype=jnp.float32) * 3.0
    target2 = jax.random.randint(k4, (N2,), 0, C2, dtype=jnp.int32)
    loss2 = label_smoothing_cross_entropy(pred2, target2, smoothing=0.1)
    jax.block_until_ready(loss2)
    ref2 = _reference(pred2, target2, smoothing=0.1)
    assert jnp.allclose(loss2, ref2, atol=1e-5, rtol=1e-5), (loss2, ref2)

    print("KERNEL_OK")
</pallas_src>

<mosaic_0001>
module attributes {stable_mosaic.version = 11 : i64} {
  func.func @_lsce_kernel(%arg0: i32, %arg1: memref<8x32xf32, #tpu.memory_space<vmem>>, %arg2: memref<8x1xi32, #tpu.memory_space<vmem>>, %arg3: memref<8x128xf32, #tpu.memory_space<vmem>>) attributes {dimension_semantics = [#tpu.dimension_semantics<parallel>], iteration_bounds = array<i64: 1>, scalar_prefetch = 0 : i64, scratch_operands = 0 : i64, tpu.core_type = #tpu.core_type<tc>, window_params = [{transform_indices = @transform_0, window_bounds = array<i64: 8, 32>}, {transform_indices = @transform_1, window_bounds = array<i64: 8, 1>}, {transform_indices = @transform_2, window_bounds = array<i64: 8, 128>}]} {
    %c0 = arith.constant 0 : index
    %c0_0 = arith.constant 0 : index
    %0 = vector.load %arg1[%c0, %c0_0] : memref<8x32xf32, #tpu.memory_space<vmem>>, vector<8x32xf32>
    %cst = arith.constant dense<0xFF800000> : vector<8xf32>
    %1 = vector.multi_reduction <maximumf>, %0, %cst [1] : vector<8x32xf32> to vector<8xf32>
    %2 = vector.shape_cast %1 : vector<8xf32> to vector<8x1xf32>
    %3 = vector.broadcast %2 : vector<8x1xf32> to vector<8x32xf32>
    %4 = arith.subf %0, %3 : vector<8x32xf32>
    %5 = math.exp %4 : vector<8x32xf32>
    %cst_1 = arith.constant dense<0.000000e+00> : vector<8xf32>
    %6 = vector.multi_reduction <add>, %5, %cst_1 [1] : vector<8x32xf32> to vector<8xf32>
    %7 = vector.shape_cast %6 : vector<8xf32> to vector<8x1xf32>
    %8 = math.log %7 : vector<8x1xf32>
    %9 = arith.addf %2, %8 : vector<8x1xf32>
    %c0_2 = arith.constant 0 : index
    %c0_3 = arith.constant 0 : index
    %10 = vector.load %arg2[%c0_2, %c0_3] : memref<8x1xi32, #tpu.memory_space<vmem>>, vector<8x1xi32>
    %11 = tpu.iota {dimensions = array<i32: 1>} : vector<8x32xi32>
    %12 = vector.broadcast %10 : vector<8x1xi32> to vector<8x32xi32>
    %13 = arith.cmpi eq, %11, %12 : vector<8x32xi32>
    %cst_4 = arith.constant 0.903124988 : f32
    %cst_5 = arith.constant 3.125000e-03 : f32
    %14 = vector.broadcast %cst_4 : f32 to vector<8x32xf32>
    %15 = vector.broadcast %cst_5 : f32 to vector<8x32xf32>
    %16 = arith.select %13, %14, %15 : vector<8x32xi1>, vector<8x32xf32>
    %17 = arith.mulf %16, %0 : vector<8x32xf32>
    %cst_6 = arith.constant dense<0.000000e+00> : vector<8xf32>
    %18 = vector.multi_reduction <add>, %17, %cst_6 [1] : vector<8x32xf32> to vector<8xf32>
    %19 = vector.shape_cast %18 : vector<8xf32> to vector<8x1xf32>
    %20 = arith.subf %9, %19 : vector<8x1xf32>
    %c8_i32 = arith.constant 8 : i32
    %21 = arith.muli %arg0, %c8_i32 : i32
    %22 = tpu.iota {dimensions = array<i32: 0>} : vector<8x1xi32>
    %23 = vector.broadcast %21 : i32 to vector<8x1xi32>
    %24 = arith.addi %23, %22 : vector<8x1xi32>
    %c8_i32_7 = arith.constant 8 : i32
    %25 = vector.broadcast %c8_i32_7 : i32 to vector<8x1xi32>
    %26 = arith.cmpi slt, %24, %25 : vector<8x1xi32>
    %cst_8 = arith.constant 0.000000e+00 : f32
    %27 = vector.broadcast %cst_8 : f32 to vector<8x1xf32>
    %28 = arith.select %26, %20, %27 : vector<8x1xi1>, vector<8x1xf32>
    %29 = vector.shape_cast %28 : vector<8x1xf32> to vector<1x8x1xf32>
    %cst_9 = arith.constant dense<0.000000e+00> : vector<1xf32>
    %30 = vector.multi_reduction <add>, %29, %cst_9 [1, 2] : vector<1x8x1xf32> to vector<1xf32>
    %31 = vector.shape_cast %30 : vector<1xf32> to vector<1x1x1xf32>
    %32 = vector.extract %31[0, 0, 0] : f32 from vector<1x1x1xf32>
    %33 = tpu.iota {dimensions = array<i32: 0>} : vector<8x128xi32>
    %34 = tpu.iota {dimensions = array<i32: 1>} : vector<8x128xi32>
    %c0_i32 = arith.constant 0 : i32
    %35 = vector.broadcast %c0_i32 : i32 to vector<8x128xi32>
    %36 = arith.cmpi eq, %33, %35 : vector<8x128xi32>
    %c0_i32_10 = arith.constant 0 : i32
    %37 = vector.broadcast %c0_i32_10 : i32 to vector<8x128xi32>
    %38 = arith.cmpi eq, %34, %37 : vector<8x128xi32>
    %39 = arith.andi %36, %38 : vector<8x128xi1>
    %cst_11 = arith.constant 0.000000e+00 : f32
    %40 = vector.broadcast %32 : f32 to vector<8x128xf32>
    %41 = vector.broadcast %cst_11 : f32 to vector<8x128xf32>
    %42 = arith.select %39, %40, %41 : vector<8x128xi1>, vector<8x128xf32>
    %c0_12 = arith.constant 0 : index
    %c0_13 = arith.constant 0 : index
    %43 = vector.load %arg3[%c0_12, %c0_13] : memref<8x128xf32, #tpu.memory_space<vmem>>, vector<8x128xf32>
    tpu.vector_store %arg3[%c0_12, %c0_13], %42 {strides = array<i32>} : memref<8x128xf32, #tpu.memory_space<vmem>>, vector<8x128xf32>,
    return
  }
  func.func @transform_0(%arg0: i32) -> (i32, i32) {
    %c0_i32 = arith.constant 0 : i32
    %c0_i32_0 = arith.constant 0 : i32
    return %arg0, %c0_i32 : i32, i32
  }
  func.func @transform_1(%arg0: i32) -> (i32, i32) {
    %c0_i32 = arith.constant 0 : i32
    %c0_i32_0 = arith.constant 0 : i32
    return %arg0, %c0_i32 : i32, i32
  }
  func.func @transform_2(%arg0: i32) -> (i32, i32) {
    %c0_i32 = arith.constant 0 : i32
    %c0_i32_0 = arith.constant 0 : i32
    return %arg0, %c0_i32 : i32, i32
  }
}

</mosaic_0001>

<bundles_post_ra>
// kernel: tpu_custom_call.1
= control target key start
LH: loop header
LB: loop body
LE: loop exit
PB: predicated region body
PF: predicated region fallthrough
CT: control target
= control target key end

     0   :  { %vm13_vm0 = vcmask 261120   ;;  %s150_s0 = inlined_call_operand.vmem [shape: f32[8,32], index: 0, kind: input, shape index: {}]   ;;  %s151_s1 = inlined_call_operand.vmem [shape: s32[8,1], index: 1, kind: input, shape index: {}]   ;;  %s152_s2 = inlined_call_operand.hbm [shape: f32[8,128], index: 2, kind: output, shape index: {}]  }
   0x1   :  { %v12_v0 = vld [vmem:[%s150_s0] sm:$0xff] }
   0x2   :  { %7 = vsyncpa [#allocation3], 0  ;;  %v14_v1 = vsel %vm13_vm0, %v12_v0, -inf  ;;  %v111_v2 = vmov 0   ;;  %v26_v3 = vld [vmem:[%s151_s1] sm:$0xff]  ;;  %v27_v6 = vlaneseq  ;;  %vm46_vm2 = vcmask 7168  }
   0x3   :  { %82 = vset.pattern.permute.xlu0 %v111_v2  ;;  %v112_v10 = vmov 0.003125   ;;  %s113_s0 = smov [#allocation2]  }
   0x4   :  { %15 = vmax.xlane.f32.xlu0 %v14_v1  ;;  %v28_v8 = vand.u32 127, %v27_v6  ;;  %v41_v30 = vshrl.u32 %v27_v6, 7  ;;  %s69_s1 = sshll.u32 %s113_s0, 4  ;;  %s70_s1 = int_to_ptr.vmem [resolvable:$true] %s69_s1 }
   0x5   :  { %s87_s14 = scalar_lea.vmem %s70_s1, 128  ;;  %p92_p1 = scmp.lt.s32.totalorder %s70_s1, %s70_s1 }
   0x6   :  { %vm57_vm3 = vcmp.eq.s32.totalorder %v41_v30, 0  ;;  %vm58_vm4 = vcmp.eq.s32.totalorder %v28_v8, 0  ;;  %p88_p0 = scmp.ne.s32.totalorder %s70_s1, %s87_s14  ;;  %p93_p2 = scmp.lt.s32.totalorder %s87_s14, %s87_s14 }
   0x7   :  { %vm59_vm5 = vmand %vm57_vm3, %vm58_vm4 }
   0x8   :  { %p94_p3 = por %p93_p2, %p92_p1 }
   0xa   :  { %p95_p4 = pnand %p94_p3, %p88_p0 }
  0x1a   :  { %30 = vperm.xlu0 %82, %v26_v3  }
  0x91   :  { %v16_v4 = vpop.xlane.xlu0 %15 }
  0x92   :  { %v17_v5 = vsub.f32 %v12_v0, %v16_v4 }
  0x94   :  { %v18_v7 = vmul.f32 1.442695, %v17_v5 }
  0x96   :  { %83 = vpow2.f32 %v18_v7 }
  0x99   :  { %v31_v9 = vpop.permute.xlu0 %30 }
  0x9a   :  { %vm32_vm1 = vcmp.eq.s32.totalorder %v28_v8, %v31_v9 }
  0x9b   :  { %v33_v11 = vsel %vm32_vm1, 0.903125, %v112_v10 }
  0x9c   :  { %v34_v12 = vmul.f32 %v33_v11, %v12_v0 }
  0x9e   :  { %v35_v15 = vsel %vm13_vm0, %v34_v12, 0.0 }
  0xa0   :  { %v84_v13 = vpop.eup %83 }
  0xa1   :  { %v20_v14 = vsel %vm13_vm0, %v84_v13, 0.0 }
  0xa2   :  { %21 = vadd.xlane.f32.xlu1 %v20_v14 }
  0xa6   :  { %36 = vadd.xlane.f32.xlu1 %v35_v15 }
 0x12f   :  { %v22_v16 = vpop.xlane.xlu1 %21 }
 0x130   :  { %85 = vlog2.f32 %v22_v16 }
 0x133   :  { %v37_v19 = vpop.xlane.xlu1 %36 }
 0x13a   :  { %v86_v17 = vpop.eup %85 }
 0x13b   :  { %v24_v18 = vmul.f32 0.6931472, %v86_v17 }
 0x13d   :  { %v25_v20 = vadd.f32 %v24_v18, %v16_v4 }
 0x13f   :  { %v38_v21 = vsub.f32 %v25_v20, %v37_v19 }
 0x141   :  { %v47_v22 = vsel %vm46_vm2, %v38_v21, 0.0 }
 0x142   :  { %48 = vadd.xlane.f32.xlu1 %v47_v22 }
 0x1cf   :  { %v49_v23 = vpop.xlane.xlu1 %48 }
 0x1d0   :  { %v50_v24 = vrot.slane %v49_v23, 4 }
 0x1d2   :  { %v51_v25 = vadd.f32 %v50_v24, %v49_v23 }
 0x1d4   :  { %v52_v26 = vrot.slane %v51_v25, 2 }
 0x1d6   :  { %v53_v27 = vadd.f32 %v52_v26, %v51_v25 }
 0x1d8   :  { %v54_v28 = vrot.slane %v53_v27, 1 }
 0x1da   :  { %v55_v29 = vadd.f32 %v54_v28, %v53_v27 }
 0x1dc   :  { %77 = vpush %v55_v29 }
 0x20d   :  { %s78_s13 = spop %77 }
 0x20e   :  { %v60_v31 = vstv %s78_s13 }
 0x20f   :  { %v61_v32 = vsel %vm59_vm5, %v60_v31, 0.0 }
 0x210   :  { %62 = vst [vmem:[#allocation2] sm:$0xff] %v61_v32 }
 0x211   :  { %98 = shalt.err (!%p95_p4)
}
 0x212   :  { %s99_s17 = scalar_lea.hbm %s152_s2, 128 }
 0x213   :  { %p100_p5 = scmp.ne.s32.totalorder %s152_s2, %s99_s17  ;;  %p103_p6 = scmp.lt.u32.totalorder %s99_s17, %s152_s2 }
 0x215   :  { %p105_p7 = pnand %p103_p6, %p100_p5 }
 0x217   :  { %108 = shalt.err (!%p105_p7)
}
 0x218   :  { %72 = dma.vmem_to_hbm [thread:$0]  %s70_s1, 128, %s152_s2, [#allocation3]  }
 0x219   :  { %109 = dma.done.wait [#allocation3], 128  }
 0x21a   :  { %110 = vsyncadd [#allocation3], 4294967168 }
 0x21b   :  { %76 = vsyncpa [#allocation3], 1 }

</bundles_post_ra>
